<compile_context>
chip_gen: v5e
topology: v5e:2x2
jax: 0.10.0
libtpu: 0.0.40
codegen_flags: <defaults>
</compile_context>

<pallas_src>
import jax
import jax.numpy as jnp
from jax.experimental import pallas as pl
from jax.experimental.pallas import tpu as pltpu

LN_EPS = 1e-5    # nn.LayerNorm default eps
RMS_EPS = 1e-6   # RMSNorm default eps (ultralytics extra_modules)


# ---------------------------------------------------------------------------
# Kernels
# ---------------------------------------------------------------------------

def _blend_kernel(lam_ref, g1_ref, b1_ref, g2_ref, x_ref, o_ref):
    """out = lam * LayerNorm(x) + (1-lam) * RMSNorm(x), fused reductions."""
    x = x_ref[...].astype(jnp.float32)                 # (TM, C)
    lam = lam_ref[0, 0]                                # scalar in SMEM
    inv_c = 1.0 / x.shape[-1]

    s1 = jnp.sum(x, axis=-1, keepdims=True)            # sum(x)
    s2 = jnp.sum(x * x, axis=-1, keepdims=True)        # sum(x^2)
    mean = s1 * inv_c
    ex2 = s2 * inv_c
    var = ex2 - mean * mean                            # biased variance (torch LN)
    inv_ln = jax.lax.rsqrt(var + LN_EPS)               # (TM, 1) -- EUP
    inv_rms = jax.lax.rsqrt(ex2 + RMS_EPS)             # (TM, 1) -- EUP

    # Fold lambda into the per-channel vectors ((1, C)-sized work only).
    g1s = lam * g1_ref[...].astype(jnp.float32)
    b1s = lam * b1_ref[...].astype(jnp.float32)
    g2s = (1.0 - lam) * g2_ref[...].astype(jnp.float32)

    out = (x - mean) * inv_ln * g1s + b1s + x * inv_rms * g2s
    o_ref[...] = out.astype(o_ref.dtype)


def _layernorm_kernel(g1_ref, b1_ref, x_ref, o_ref):
    """Pure LayerNorm (lam == 1 specialization)."""
    x = x_ref[...].astype(jnp.float32)
    inv_c = 1.0 / x.shape[-1]
    s1 = jnp.sum(x, axis=-1, keepdims=True)
    s2 = jnp.sum(x * x, axis=-1, keepdims=True)
    mean = s1 * inv_c
    var = s2 * inv_c - mean * mean
    inv_ln = jax.lax.rsqrt(var + LN_EPS)
    out = (x - mean) * inv_ln * g1_ref[...].astype(jnp.float32) \
        + b1_ref[...].astype(jnp.float32)
    o_ref[...] = out.astype(o_ref.dtype)


def _rmsnorm_kernel(g2_ref, x_ref, o_ref):
    """Pure RMSNorm (lam == 0 specialization)."""
    x = x_ref[...].astype(jnp.float32)
    ms = jnp.mean(x * x, axis=-1, keepdims=True)
    inv_rms = jax.lax.rsqrt(ms + RMS_EPS)
    out = x * inv_rms * g2_ref[...].astype(jnp.float32)
    o_ref[...] = out.astype(o_ref.dtype)


# ---------------------------------------------------------------------------
# Wrapper
# ---------------------------------------------------------------------------

def _choose_tile_rows(rows, C, itemsize):
    """Largest row tile that fits a conservative VMEM budget, sublane-aligned."""
    gran = 16 if itemsize == 2 else 8          # bf16 packs 16 rows per sublane group
    # ~6 MiB per x tile keeps (double-buffered in + out) well under the default
    # 32 MiB scoped VMEM limit on v5e/v6e/v7x.
    cap_vmem = max(gran, (6 * 1024 * 1024) // max(1, C * itemsize))
    cap = min(1024, cap_vmem)

    if rows <= cap:
        # Small enough to do in one shot; but if it is big enough to matter,
        # split into 2 steps so a 2-TensorCore chip gets both cores working.
        if rows >= 2 * 128:
            half = -(-rows // 2)                # ceil(rows / 2)
            tile = -(-half // gran) * gran      # round up to granularity
            if tile < rows:
                return tile
        return rows                             # full extent is always legal
    return max(gran, (cap // gran) * gran)


def linear_norm_blend(x, lam, gamma1, beta1, gamma2, *, tile_rows=None):
    """x: (B, N, C). Returns lam*LayerNorm(x) + (1-lam)*RMSNorm(x), same shape/dtype."""
    B, N, C = x.shape
    rows = B * N
    x2 = x.reshape(rows, C)

    if tile_rows is None:
        tile_rows = _choose_tile_rows(rows, C, x2.dtype.itemsize)
    grid = (pl.cdiv(rows, tile_rows),)          # ragged tail handled by Pallas masking

    x_spec = pl.BlockSpec((tile_rows, C), lambda i: (i, 0))
    o_spec = pl.BlockSpec((tile_rows, C), lambda i: (i, 0))
    vec_spec = pl.BlockSpec((1, C), lambda i: (0, 0))
    cparams = pltpu.CompilerParams(dimension_semantics=("parallel",))
    out_shape = jax.ShapeDtypeStruct((rows, C), x.dtype)

    g1 = gamma1.reshape(1, C)
    b1 = beta1.reshape(1, C)
    g2 = gamma2.reshape(1, C)

    # Trace-time specialization when lam is a concrete Python/NumPy scalar.
    lam_static = None
    try:
        lam_static = float(lam)
    except TypeError:
        pass

    if lam_static == 1.0:
        out = pl.pallas_call(
            _layernorm_kernel,
            out_shape=out_shape,
            grid=grid,
            in_specs=[vec_spec, vec_spec, x_spec],
            out_specs=o_spec,
            compiler_params=cparams,
        )(g1, b1, x2)
    elif lam_static == 0.0:
        out = pl.pallas_call(
            _rmsnorm_kernel,
            out_shape=out_shape,
            grid=grid,
            in_specs=[vec_spec, x_spec],
            out_specs=o_spec,
            compiler_params=cparams,
        )(g2, x2)
    else:
        lam_arr = jnp.asarray(lam, jnp.float32).reshape(1, 1)
        out = pl.pallas_call(
            _blend_kernel,
            out_shape=out_shape,
            grid=grid,
            in_specs=[
                pl.BlockSpec(memory_space=pltpu.SMEM),   # lambda scalar
                vec_spec,                                # LayerNorm weight
                vec_spec,                                # LayerNorm bias
                vec_spec,                                # RMSNorm weight
                x_spec,                                  # x tile
            ],
            out_specs=o_spec,
            compiler_params=cparams,
        )(lam_arr, g1, b1, g2, x2)

    return out.reshape(B, N, C)


class LinearNorm:
    """JAX/Pallas mirror of the PyTorch LinearNorm (norm1=LayerNorm, norm2=RMSNorm)."""

    def __init__(self, dim, warm=0, step=300000, r0=1.0):
        self.warm = int(warm)
        self.iter = int(step)
        self.total_step = int(step)
        self.r0 = float(r0)
        # Parameter init mirrors nn.LayerNorm / RMSNorm defaults (ones / zeros).
        self.ln_weight = jnp.ones((dim,), jnp.float32)
        self.ln_bias = jnp.zeros((dim,), jnp.float32)
        self.rms_weight = jnp.ones((dim,), jnp.float32)
        self.training = True

    def __call__(self, x):
        if self.training:
            if self.warm > 0:
                self.warm -= 1
                lam = 1.0                        # pure norm1 (LayerNorm)
            else:
                lam = self.r0 * self.iter / self.total_step
                if self.iter > 0:
                    self.iter -= 1
        else:
            lam = 0.0                            # pure norm2 (RMSNorm)
        return linear_norm_blend(x, lam, self.ln_weight, self.ln_bias, self.rms_weight)


# ---------------------------------------------------------------------------
# Reference + test
# ---------------------------------------------------------------------------

def _reference(x, lam, g1, b1, g2):
    xf = x.astype(jnp.float32)
    mean = jnp.mean(xf, axis=-1, keepdims=True)
    var = jnp.mean((xf - mean) ** 2, axis=-1, keepdims=True)
    ln = (xf - mean) * jax.lax.rsqrt(var + LN_EPS) * g1 + b1
    rms = xf * jax.lax.rsqrt(jnp.mean(xf * xf, axis=-1, keepdims=True) + RMS_EPS) * g2
    return (lam * ln + (1.0 - lam) * rms).astype(x.dtype)


if __name__ == "__main__":
    key = jax.random.PRNGKey(0)

    # --- small demo shape consistent with the module (batch=2, seq=8, hidden=32)
    B, N, C = 2, 8, 32
    x = jax.random.normal(key, (B, N, C), dtype=jnp.float32)

    mod = LinearNorm(C, warm=1, step=300000, r0=1.0)

    y_warm = mod(x)                  # training, warm>0  -> pure LayerNorm (lam=1)
    y_train = mod(x)                 # training, warm==0 -> blend (lam=iter/total)
    mod.training = False
    y_eval = mod(x)                  # eval              -> pure RMSNorm (lam=0)
    jax.block_until_ready((y_warm, y_train, y_eval))

    ref_warm = _reference(x, 1.0, mod.ln_weight, mod.ln_bias, mod.rms_weight)
    ref_train = _reference(x, 1.0 * 300000 / 300000, mod.ln_weight, mod.ln_bias, mod.rms_weight)
    ref_eval = _reference(x, 0.0, mod.ln_weight, mod.ln_bias, mod.rms_weight)

    assert jnp.allclose(y_warm, ref_warm, atol=1e-4, rtol=1e-4)
    assert jnp.allclose(y_train, ref_train, atol=1e-4, rtol=1e-4)
    assert jnp.allclose(y_eval, ref_eval, atol=1e-4, rtol=1e-4)
    assert y_eval.shape == (B, N, C)

    # --- larger, non-divisible shape: exercises big tiles + masked tail block +
    #     the genuine blend path (0 < lam < 1).
    key2 = jax.random.PRNGKey(0)
    B2, N2, C2 = 2, 300, 256          # rows = 600 -> tile 304, grid 2, partial tail
    kw = jax.random.split(key2, 4)
    x_big = jax.random.normal(kw[0], (B2, N2, C2), dtype=jnp.float32)
    g1b = jax.random.normal(kw[1], (C2,), dtype=jnp.float32)
    b1b = jax.random.normal(kw[2], (C2,), dtype=jnp.float32)
    g2b = jax.random.normal(kw[3], (C2,), dtype=jnp.float32)
    lam_mid = 0.37
    y_big = linear_norm_blend(x_big, lam_mid, g1b, b1b, g2b)
    jax.block_until_ready(y_big)
    ref_big = _reference(x_big, lam_mid, g1b, b1b, g2b)
    assert jnp.allclose(y_big, ref_big, atol=1e-4, rtol=1e-4)

    # --- bf16 path: exercises the 16-row sublane granularity + dtype round-trip.
    x_bf = x_big.astype(jnp.bfloat16)
    y_bf = linear_norm_blend(x_bf, lam_mid, g1b, b1b, g2b)
    jax.block_until_ready(y_bf)
    ref_bf = _reference(x_bf, lam_mid, g1b, b1b, g2b)
    assert jnp.allclose(y_bf.astype(jnp.float32), ref_bf.astype(jnp.float32),
                        atol=5e-2, rtol=5e-2)

    print("KERNEL_OK")
</pallas_src>

<mosaic_0001>
module attributes {stable_mosaic.version = 11 : i64} {
  func.func @_layernorm_kernel(%arg0: i32, %arg1: memref<1x32xf32, #tpu.memory_space<vmem>>, %arg2: memref<1x32xf32, #tpu.memory_space<vmem>>, %arg3: memref<16x32xf32, #tpu.memory_space<vmem>>, %arg4: memref<16x32xf32, #tpu.memory_space<vmem>>) attributes {dimension_semantics = [#tpu.dimension_semantics<parallel>], iteration_bounds = array<i64: 1>, scalar_prefetch = 0 : i64, scratch_operands = 0 : i64, tpu.core_type = #tpu.core_type<tc>, window_params = [{pipeline_mode = #tpu.pipeline_mode<synchronous>, transform_indices = @transform_0, window_bounds = array<i64: 1, 32>}, {pipeline_mode = #tpu.pipeline_mode<synchronous>, transform_indices = @transform_1, window_bounds = array<i64: 1, 32>}, {transform_indices = @transform_2, window_bounds = array<i64: 16, 32>}, {transform_indices = @transform_3, window_bounds = array<i64: 16, 32>}]} {
    %c0 = arith.constant 0 : index
    %c0_0 = arith.constant 0 : index
    %0 = vector.load %arg3[%c0, %c0_0] : memref<16x32xf32, #tpu.memory_space<vmem>>, vector<16x32xf32>
    %cst = arith.constant dense<0.000000e+00> : vector<16xf32>
    %1 = vector.multi_reduction <add>, %0, %cst [1] : vector<16x32xf32> to vector<16xf32>
    %2 = vector.shape_cast %1 : vector<16xf32> to vector<16x1xf32>
    %3 = arith.mulf %0, %0 : vector<16x32xf32>
    %cst_1 = arith.constant dense<0.000000e+00> : vector<16xf32>
    %4 = vector.multi_reduction <add>, %3, %cst_1 [1] : vector<16x32xf32> to vector<16xf32>
    %5 = vector.shape_cast %4 : vector<16xf32> to vector<16x1xf32>
    %cst_2 = arith.constant 3.125000e-02 : f32
    %6 = vector.broadcast %cst_2 : f32 to vector<16x1xf32>
    %7 = arith.mulf %2, %6 : vector<16x1xf32>
    %cst_3 = arith.constant 3.125000e-02 : f32
    %8 = vector.broadcast %cst_3 : f32 to vector<16x1xf32>
    %9 = arith.mulf %5, %8 : vector<16x1xf32>
    %10 = arith.mulf %7, %7 : vector<16x1xf32>
    %11 = arith.subf %9, %10 : vector<16x1xf32>
    %cst_4 = arith.constant 9.99999974E-6 : f32
    %12 = vector.broadcast %cst_4 : f32 to vector<16x1xf32>
    %13 = arith.addf %11, %12 : vector<16x1xf32>
    %14 = math.rsqrt %13 : vector<16x1xf32>
    %15 = vector.broadcast %7 : vector<16x1xf32> to vector<16x32xf32>
    %16 = arith.subf %0, %15 : vector<16x32xf32>
    %17 = vector.broadcast %14 : vector<16x1xf32> to vector<16x32xf32>
    %18 = arith.mulf %16, %17 : vector<16x32xf32>
    %c0_5 = arith.constant 0 : index
    %c0_6 = arith.constant 0 : index
    %19 = vector.load %arg1[%c0_5, %c0_6] : memref<1x32xf32, #tpu.memory_space<vmem>>, vector<1x32xf32>
    %20 = vector.broadcast %19 : vector<1x32xf32> to vector<16x32xf32>
    %21 = arith.mulf %18, %20 : vector<16x32xf32>
    %c0_7 = arith.constant 0 : index
    %c0_8 = arith.constant 0 : index
    %22 = vector.load %arg2[%c0_7, %c0_8] : memref<1x32xf32, #tpu.memory_space<vmem>>, vector<1x32xf32>
    %23 = vector.broadcast %22 : vector<1x32xf32> to vector<16x32xf32>
    %24 = arith.addf %21, %23 : vector<16x32xf32>
    %c0_9 = arith.constant 0 : index
    %c0_10 = arith.constant 0 : index
    %25 = vector.load %arg4[%c0_9, %c0_10] : memref<16x32xf32, #tpu.memory_space<vmem>>, vector<16x32xf32>
    tpu.vector_store %arg4[%c0_9, %c0_10], %24 {strides = array<i32>} : memref<16x32xf32, #tpu.memory_space<vmem>>, vector<16x32xf32>,
    return
  }
  func.func @transform_0(%arg0: i32) -> (i32, i32) {
    %c0_i32 = arith.constant 0 : i32
    %c0_i32_0 = arith.constant 0 : i32
    %c0_i32_1 = arith.constant 0 : i32
    return %c0_i32, %c0_i32_0 : i32, i32
  }
  func.func @transform_1(%arg0: i32) -> (i32, i32) {
    %c0_i32 = arith.constant 0 : i32
    %c0_i32_0 = arith.constant 0 : i32
    %c0_i32_1 = arith.constant 0 : i32
    return %c0_i32, %c0_i32_0 : i32, i32
  }
  func.func @transform_2(%arg0: i32) -> (i32, i32) {
    %c0_i32 = arith.constant 0 : i32
    %c0_i32_0 = arith.constant 0 : i32
    return %arg0, %c0_i32 : i32, i32
  }
  func.func @transform_3(%arg0: i32) -> (i32, i32) {
    %c0_i32 = arith.constant 0 : i32
    %c0_i32_0 = arith.constant 0 : i32
    return %arg0, %c0_i32 : i32, i32
  }
}

</mosaic_0001>

<bundles_post_ra>
// kernel: tpu_custom_call.1
= control target key start
LH: loop header
LB: loop body
LE: loop exit
PB: predicated region body
PF: predicated region fallthrough
CT: control target
= control target key end

     0   :  { %8 = vsyncpa [#allocation3], 0  ;;  %s307_s0 = inlined_call_operand.hbm [shape: f32[1,32], index: 0, kind: input, shape index: {}]   ;;  %s308_s1 = inlined_call_operand.hbm [shape: f32[1,32], index: 1, kind: input, shape index: {}]   ;;  %s309_s2 = inlined_call_operand.hbm [shape: f32[16,32], index: 2, kind: input, shape index: {}]   ;;  %s310_s3 = inlined_call_operand.hbm [shape: f32[16,32], index: 3, kind: output, shape index: {}]  }
   0x1   :  { %9 = vsyncpa [#allocation6], 0  ;;  %s27_s14 = sshll.u32 %s308_s1, 4  ;;  %s28_s14 = int_to_ptr.hbm [resolvable:$true] %s27_s14 }
   0x2   :  { %10 = vsyncpa [#allocation4], 0  ;;  %s257_s15 = smov [#allocation5]   ;;  %s16_s19 = sshll.u32 %s307_s0, 4  ;;  %s17_s19 = int_to_ptr.hbm [resolvable:$true] %s16_s19 }
   0x3   :  { %s29_s16 = sshll.u32 %s257_s15, 4  ;;  %s258_s20 = smov [#allocation2]   ;;  %s30_s16 = int_to_ptr.vmem [resolvable:$true] %s29_s16 }
   0x4   :  { %32 = dma.hbm_to_vmem [thread:$0]  %s28_s14, 16, %s30_s16, [#allocation6]  }
   0x5   :  { %s18_s21 = sshll.u32 %s258_s20, 4  ;;  %s37_s24 = sshll.u32 %s309_s2, 4  ;;  %s19_s21 = int_to_ptr.vmem [resolvable:$true] %s18_s21  ;;  %s38_s24 = int_to_ptr.hbm [resolvable:$true] %s37_s24 }
   0x6   :  { %21 = dma.hbm_to_vmem [thread:$0]  %s17_s19, 16, %s19_s21, [#allocation3]  }
   0x7   :  { %s259_s1 = smov [#allocation7]   ;;  %s260_s26 = smov 128  }
   0x8   :  { %s39_s25 = sshll.u32 %s259_s1, 4  ;;  %s261_s27 = smov 8   ;;  %s40_s25 = int_to_ptr.vmem [resolvable:$true] %s39_s25 }
   0x9   :  { %45 = dma.hbm_to_vmem [thread:$0]  %s38_s24, 256, %s40_s25, [#allocation6], %s260_s26, %s260_s26, %s261_s27  }
   0xa   :  { %251 = dma.done.wait [#allocation3], 16  }
   0xb   :  { %252 = vsyncadd [#allocation3], 4294967280 }
   0xc   :  { %253 = dma.done.wait [#allocation6], 272  }
   0xd   :  { %254 = vsyncadd [#allocation6], 4294967024  ;;  %vm60_vm0 = vcmask 261120   ;;  %v58_v0 = vld [vmem:[#allocation7] sm:$0xff]  ;;  %v59_v3 = vld [vmem:[#allocation7 + $0x8] sm:$0xff]  ;;  %s262_s0 = smov [#allocation8]  }
   0xe   :  { %v61_v1 = vsel %vm60_vm0, %v58_v0, 0.0  ;;  %v67_v2 = vmul.f32 %v58_v0, %v58_v0  ;;  %v68_v5 = vmul.f32 %v59_v3, %v59_v3  ;;  %v64_v6 = vsel %vm60_vm0, %v59_v3, 0.0  ;;  %v149_v31 = vld [vmem:[#allocation2] ss:$0 sm:$0xff]  ;;  %v150_v35 = vld [vmem:[#allocation5] ss:$0 sm:$0xff] }
   0xf   :  { %62 = vadd.xlane.f32.xlu0 %v61_v1  ;;  %s127_s2 = sshll.u32 %s262_s0, 4  ;;  %s129_s30 = sshll.u32 %s310_s3, 4  ;;  %s128_s2 = int_to_ptr.vmem [resolvable:$true] %s127_s2  ;;  %s130_s30 = int_to_ptr.hbm [resolvable:$true] %s129_s30 }
  0x10   :  { %v69_v4 = vsel %vm60_vm0, %v67_v2, 0.0  ;;  %v72_v7 = vsel %vm60_vm0, %v68_v5, 0.0 }
  0x11   :  { %70 = vadd.xlane.f32.xlu1 %v69_v4 }
  0x17   :  { %65 = vadd.xlane.f32.xlu0 %v64_v6 }
  0x19   :  { %73 = vadd.xlane.f32.xlu1 %v72_v7 }
  0x82   :  { %v63_v8 = vpop.xlane.xlu0 %62 }
  0x83   :  { %v75_v9 = vmul.f32 0.03125, %v63_v8 }
  0x84   :  { %v71_v10 = vpop.xlane.xlu1 %70 }
  0x85   :  { %v79_v11 = vmul.f32 %v75_v9, %v75_v9  ;;  %v77_v12 = vmul.f32 0.03125, %v71_v10  ;;  %v105_v30 = vsub.f32 %v58_v0, %v75_v9 }
  0x87   :  { %v81_v13 = vsub.f32 %v77_v12, %v79_v11 }
  0x89   :  { %v83_v14 = vadd.f32 1e-05, %v81_v13 }
  0x8a   :  { %v66_v15 = vpop.xlane.xlu0 %65 }
  0x8b   :  { %151 = vrsqrt.f32 %v83_v14  ;;  %v76_v16 = vmul.f32 0.03125, %v66_v15  ;;  %vm91_vm2 = vweird.f32 %v83_v14 }
  0x8c   :  { %v74_v17 = vpop.xlane.xlu1 %73 }
  0x8d   :  { %v80_v18 = vmul.f32 %v76_v16, %v76_v16  ;;  %v78_v19 = vmul.f32 0.03125, %v74_v17  ;;  %v106_v41 = vsub.f32 %v59_v3, %v76_v16 }
  0x8f   :  { %v82_v20 = vsub.f32 %v78_v19, %v80_v18 }
  0x91   :  { %v152_v21 = vpop.eup %151  ;;  %v84_v22 = vadd.f32 1e-05, %v82_v20 }
  0x92   :  { %v86_v23 = vmul.f32 %v152_v21, %v83_v14  ;;  %vm92_vm1 = vweird.f32 %v152_v21 }
  0x93   :  { %153 = vrsqrt.f32 %v84_v22  ;;  %vm93_vm3 = vmor %vm91_vm2, %vm92_vm1  ;;  %vm101_vm5 = vweird.f32 %v84_v22 }
  0x94   :  { %v87_v24 = vmul.f32 %v152_v21, %v86_v23 }
  0x96   :  { %v88_v25 = vmul.f32 0.5, %v87_v24 }
  0x98   :  { %v89_v26 = vsub.f32 1.5, %v88_v25 }
  0x99   :  { %v154_v27 = vpop.eup %153 }
  0x9a   :  { %v90_v28 = vmul.f32 %v152_v21, %v89_v26  ;;  %v96_v29 = vmul.f32 %v154_v27, %v84_v22  ;;  %vm102_vm4 = vweird.f32 %v154_v27 }
  0x9b   :  { %vm103_vm6 = vmor %vm101_vm5, %vm102_vm4 }
  0x9c   :  { %v94_v32 = vsel %vm93_vm3, %v152_v21, %v90_v28  ;;  %v97_v33 = vmul.f32 %v154_v27, %v96_v29 }
  0x9d   :  { %v107_v34 = vmul.f32 %v105_v30, %v94_v32 }
  0x9e   :  { %v98_v36 = vmul.f32 0.5, %v97_v33 }
  0x9f   :  { %v113_v37 = vmul.f32 %v149_v31, %v107_v34 }
  0xa0   :  { %v99_v38 = vsub.f32 1.5, %v98_v36 }
  0xa1   :  { %v119_v39 = vadd.f32 %v150_v35, %v113_v37 }
  0xa2   :  { %v100_v40 = vmul.f32 %v154_v27, %v99_v38 }
  0xa3   :  { %121 = vst.msk [vmem:[#allocation8] sm:$0xff] %vm60_vm0, %v119_v39 }
  0xa4   :  { %v104_v42 = vsel %vm103_vm6, %v154_v27, %v100_v40 }
  0xa5   :  { %v108_v43 = vmul.f32 %v106_v41, %v104_v42 }
  0xa7   :  { %v114_v44 = vmul.f32 %v149_v31, %v108_v43 }
  0xa9   :  { %v120_v45 = vadd.f32 %v150_v35, %v114_v44 }
  0xab   :  { %122 = vst.msk [vmem:[#allocation8 + $0x8] sm:$0xff] %vm60_vm0, %v120_v45 }
  0xac   :  { %135 = dma.vmem_to_hbm [thread:$0]  %s128_s2, 256, %s130_s30, [#allocation4], %s260_s26, %s260_s26, %s261_s27  }
  0xad   :  { %255 = dma.done.wait [#allocation4], 256  }
  0xae   :  { %256 = vsyncadd [#allocation4], 4294967040 }
  0xaf   :  { %140 = vsyncpa [#allocation3], 1 }
  0xb0   :  { %141 = vsyncpa [#allocation6], 1 }
  0xb1   :  { %142 = vsyncpa [#allocation4], 1 }

</bundles_post_ra>
